<compile_context>
chip_gen: v5e
topology: v5e:2x2
jax: 0.10.0
libtpu: 0.0.40
codegen_flags: <defaults>
</compile_context>

<pallas_src>
import functools

import jax
import jax.numpy as jnp
import numpy as np
from jax.experimental import pallas as pl
from jax.experimental.pallas import tpu as pltpu


def _round_up(n, m):
    return -(-n // m) * m


def _cdiv(a, b):
    return -(-a // b)


# ----------------------------------------------------------------------------
# VMEM budgeting
# ----------------------------------------------------------------------------
def _vmem_capacity_bytes():
    try:
        return int(pltpu.get_tpu_info().vmem_capacity_bytes)
    except Exception:
        return 64 << 20            # conservative fallback (v7x per-core VMEM)


def _pick_t_chunk(seq_len, b_pad, hidden, xw_itemsize, w_itemsize):
    """Budget-driven time-chunk for the recurrence kernel."""
    vmem_cap = _vmem_capacity_bytes()
    # ~<48 MiB on v7x (64 MiB VMEM), ~<96 MiB on v5e/v6e (128 MiB VMEM).
    vmem_limit = int(min(vmem_cap * 3 // 4, 96 << 20))
    H = hidden
    resident = 12 * H * H * w_itemsize          # whh0 + wih1 + whh1 (1-buffered)
    resident += (4 * H + H + 1) * 4             # b1, wfc, bfc (f32)
    resident += 4 * b_pad * H * 4               # h/c scratch (f32)
    resident += b_pad * 4                       # output tile
    per_step = 2 * b_pad * 4 * H * xw_itemsize  # xw double buffer per timestep
    avail = vmem_limit - resident - (4 << 20)   # headroom for compiler scratch
    t_chunk = int(min(seq_len, 512, max(1, avail // max(per_step, 1))))
    return max(1, t_chunk), vmem_limit


# ----------------------------------------------------------------------------
# Kernel 1: hoisted layer-0 input projection  xw = x @ W_ih0^T + (b_ih0+b_hh0)
# (weights/bias already carry the 0.5 sigmoid-fold on the i/f/o columns)
# ----------------------------------------------------------------------------
def _input_proj_kernel(x_ref, w_ref, b_ref, o_ref, *, compute_dtype):
    acc = (jnp.dot(x_ref[...].astype(compute_dtype), w_ref[...],
                   preferred_element_type=jnp.float32)
           + b_ref[...])
    o_ref[...] = acc.astype(o_ref.dtype)


def _input_projection(x2d, w, b, *, compute_dtype, out_dtype,
                      vmem_limit_bytes, row_tile=512):
    n, d = x2d.shape
    g = w.shape[1]
    # Divisor-friendly row tile: minimal number of blocks, minimal padding.
    n8 = _round_up(n, 8)
    n_blocks = max(1, _cdiv(n8, row_tile))
    tn = _round_up(_cdiv(n8, n_blocks), 8)
    n_pad = tn * n_blocks
    if n_pad != n:
        x2d = jnp.pad(x2d, ((0, n_pad - n), (0, 0)))
    out = pl.pallas_call(
        functools.partial(_input_proj_kernel, compute_dtype=compute_dtype),
        out_shape=jax.ShapeDtypeStruct((n_pad, g), out_dtype),
        grid_spec=pltpu.PrefetchScalarGridSpec(
            num_scalar_prefetch=0,
            grid=(n_blocks,),
            in_specs=[
                pl.BlockSpec((tn, d), lambda i: (i, 0)),
                pl.BlockSpec((d, g), lambda i: (0, 0)),
                pl.BlockSpec((1, g), lambda i: (0, 0)),
            ],
            out_specs=pl.BlockSpec((tn, g), lambda i: (i, 0)),
        ),
        compiler_params=pltpu.CompilerParams(
            dimension_semantics=("parallel",),
            vmem_limit_bytes=vmem_limit_bytes),
    )(x2d, w, b)
    return out[:n]


# ----------------------------------------------------------------------------
# Kernel 2: the serial 2-layer LSTM recurrence + final FC (last chunk only)
# ----------------------------------------------------------------------------
def _lstm_recurrence_kernel(xw_ref,     # (TCHUNK, B, 4H)  layer-0 pre-act (incl. b0, 0.5-folded)
                            whh0_ref,   # (H, 4H)   compute_dtype, 0.5-folded on i/f/o
                            wih1_ref,   # (H, 4H)   compute_dtype, 0.5-folded on i/f/o
                            whh1_ref,   # (H, 4H)   compute_dtype, 0.5-folded on i/f/o
                            b1_ref,     # (1, 4H)   f32, 0.5-folded on i/f/o
                            wfc_ref,    # (1, H)
                            bfc_ref,    # (1, 1)
                            out_ref,    # (B, 1)
                            h0_ref, c0_ref, h1_ref, c1_ref,   # VMEM scratch (B, H) f32
                            *, hidden_size, seq_len, t_chunk, compute_dtype,
                            unroll):
    H = hidden_size
    B = h0_ref.shape[0]
    chunk = pl.program_id(0)
    n_chunks = pl.num_programs(0)

    @pl.when(chunk == 0)
    def _init():
        h0_ref[...] = jnp.zeros_like(h0_ref)
        c0_ref[...] = jnp.zeros_like(c0_ref)
        h1_ref[...] = jnp.zeros_like(h1_ref)
        c1_ref[...] = jnp.zeros_like(c1_ref)

    # ---- loop-invariant values, hoisted out of the time loop ----
    whh0 = whh0_ref[...]                               # already compute_dtype
    wih1 = wih1_ref[...]
    whh1 = whh1_ref[...]
    b1 = jnp.broadcast_to(b1_ref[...], (B, 4 * H))     # hoisted broadcast
    # Lane mask for the tanh ('g') gate columns [2H, 3H).
    col = jax.lax.broadcasted_iota(jnp.int32, (B, 4 * H), 1)
    g_mask = (col >= 2 * H) & (col < 3 * H)

    def activate(gates):
        # i/f/o pre-activations were pre-scaled by 0.5 in the wrapper, so
        # sigmoid(x) == 0.5*tanh(x/2)+0.5: a SINGLE tanh pass over the full
        # (B, 4H) slab + a VPU affine/select. Halves EUP work per timestep.
        t = jnp.tanh(gates)
        return jnp.where(g_mask, t, 0.5 * t + 0.5)

    def cell_update(act, c):
        i = act[:, 0 * H:1 * H]
        f = act[:, 1 * H:2 * H]
        g = act[:, 2 * H:3 * H]
        o = act[:, 3 * H:4 * H]
        c_new = f * c + i * g
        h_new = o * jnp.tanh(c_new)
        return h_new, c_new

    needs_mask = (seq_len % t_chunk) != 0
    chunk_start = chunk * t_chunk

    def step(t, carry):
        h0, c0, h1, c1 = carry
        # --- layer 0: only the recurrent matmul sits on the serial path ---
        gates0 = (jnp.dot(h0.astype(compute_dtype), whh0,
                          preferred_element_type=jnp.float32)
                  + xw_ref[t].astype(jnp.float32))
        h0n, c0n = cell_update(activate(gates0), c0)
        # --- layer 1: split matmuls, f32 accumulation, no concatenate ---
        gates1 = (jnp.dot(h0n.astype(compute_dtype), wih1,
                          preferred_element_type=jnp.float32)
                  + jnp.dot(h1.astype(compute_dtype), whh1,
                            preferred_element_type=jnp.float32)
                  + b1)
        h1n, c1n = cell_update(activate(gates1), c1)
        if needs_mask:   # only emitted when T % t_chunk != 0
            valid = (chunk_start + t) < seq_len
            h0n = jnp.where(valid, h0n, h0)
            c0n = jnp.where(valid, c0n, c0)
            h1n = jnp.where(valid, h1n, h1)
            c1n = jnp.where(valid, c1n, c1)
        return h0n, c0n, h1n, c1n

    carry = (h0_ref[...], c0_ref[...], h1_ref[...], c1_ref[...])
    h0, c0, h1, c1 = jax.lax.fori_loop(0, t_chunk, step, carry, unroll=unroll)
    h0_ref[...] = h0
    c0_ref[...] = c0
    h1_ref[...] = h1
    c1_ref[...] = c1

    # Final FC on the top-layer hidden state: only on the LAST chunk, so the
    # XLU lane reduction + narrow (B,1) store is off every other chunk's tail.
    @pl.when(chunk == n_chunks - 1)
    def _fc():
        out_ref[...] = (jnp.sum(h1 * wfc_ref[...], axis=-1, keepdims=True)
                        + bfc_ref[...])


def _lstm_recurrence(xw, whh0, wih1, whh1, b1, wfc, bfc, *, hidden_size,
                     seq_len, t_chunk, compute_dtype, vmem_limit_bytes):
    t_pad, b_pad, g4 = xw.shape
    n_chunks = t_pad // t_chunk
    unroll = True if t_chunk <= 32 else 8
    kernel = functools.partial(
        _lstm_recurrence_kernel, hidden_size=hidden_size, seq_len=seq_len,
        t_chunk=t_chunk, compute_dtype=compute_dtype, unroll=unroll)

    def call(weight_mode):
        def wspec(shape):
            # Constant-index weights/biases: single-buffer if supported.
            if weight_mode is None:
                return pl.BlockSpec(shape, lambda t: (0,) * len(shape))
            return pl.BlockSpec(shape, lambda t: (0,) * len(shape),
                                pipeline_mode=weight_mode)

        return pl.pallas_call(
            kernel,
            out_shape=jax.ShapeDtypeStruct((b_pad, 1), jnp.float32),
            grid_spec=pltpu.PrefetchScalarGridSpec(
                num_scalar_prefetch=0,
                grid=(n_chunks,),
                in_specs=[
                    pl.BlockSpec((t_chunk, b_pad, g4), lambda t: (t, 0, 0)),
                    wspec(whh0.shape),
                    wspec(wih1.shape),
                    wspec(whh1.shape),
                    wspec(b1.shape),
                    wspec(wfc.shape),
                    wspec(bfc.shape),
                ],
                out_specs=pl.BlockSpec((b_pad, 1), lambda t: (0, 0)),
                scratch_shapes=[pltpu.VMEM((b_pad, hidden_size), jnp.float32)
                                for _ in range(4)],
            ),
            compiler_params=pltpu.CompilerParams(
                dimension_semantics=("arbitrary",),   # state carries across chunks
                vmem_limit_bytes=vmem_limit_bytes),
        )(xw, whh0, wih1, whh1, b1, wfc, bfc)

    try:
        return call(pl.Buffered(1))
    except Exception:
        # pipeline_mode unsupported on this JAX version: fall back to default
        # double-buffered weights (correctness unchanged).
        return call(None)


# ----------------------------------------------------------------------------
# Wrapper
# ----------------------------------------------------------------------------
def lstm_model_forward(x, params, hidden_size, *, compute_dtype=jnp.float32,
                       t_chunk=None):
    """x: (B, T, D) float32 -> (B, 1) float32 (matches LSTMModel.forward)."""
    B, T, D = x.shape
    H = hidden_size
    is_bf16 = jnp.dtype(compute_dtype) == jnp.dtype(jnp.bfloat16)

    # Pad batch to the sublane packing of the matmul operand dtype.
    row_mult = 16 if is_bf16 else 8
    b_pad = max(row_mult, _round_up(B, row_mult))
    x = x.astype(jnp.float32)
    if b_pad != B:
        x = jnp.pad(x, ((0, b_pad - B), (0, 0), (0, 0)))
    x_tm = jnp.transpose(x, (1, 0, 2))            # (T, b_pad, D) time-major

    # Fold the sigmoid->tanh rescale (sigmoid(x) = 0.5*tanh(x/2)+0.5) into the
    # i/f/o gate columns of every weight/bias feeding a gate pre-activation.
    gscale = jnp.concatenate([
        jnp.full((2 * H,), 0.5, jnp.float32),     # i, f
        jnp.ones((H,), jnp.float32),              # g (tanh) unchanged
        jnp.full((H,), 0.5, jnp.float32),         # o
    ]).reshape(1, 4 * H)

    wih0 = (params["wih0_t"] * gscale).astype(compute_dtype)   # (D, 4H)
    b0 = params["b0"] * gscale                                  # (1, 4H) f32
    whh0 = (params["whh0_t"] * gscale).astype(compute_dtype)    # (H, 4H)
    w1 = params["w1_stack"] * gscale                            # (2H, 4H)
    wih1 = w1[:H].astype(compute_dtype)                         # (H, 4H)
    whh1 = w1[H:].astype(compute_dtype)                         # (H, 4H)
    b1 = params["b1"] * gscale                                  # (1, 4H) f32
    wfc = params["wfc_row"]                                     # (1, H)  f32
    bfc = params["bfc"]                                         # (1, 1)  f32

    # bf16 operands -> store the projected gates (xw) in bf16 too (halves the
    # biggest HBM round trip and the xw double buffer). f32 path stays f32.
    xw_dtype = jnp.bfloat16 if is_bf16 else jnp.float32
    xw_itemsize = jnp.dtype(xw_dtype).itemsize
    w_itemsize = jnp.dtype(compute_dtype).itemsize

    t_auto, vmem_limit = _pick_t_chunk(T, b_pad, H, xw_itemsize, w_itemsize)
    if t_chunk is None:
        t_chunk = t_auto
    t_chunk = max(1, min(t_chunk, T))
    t_pad = _round_up(T, t_chunk)

    # Hoisted layer-0 input projection (one big MXU matmul, bias folded in).
    xw2d = _input_projection(x_tm.reshape(T * b_pad, D), wih0, b0,
                             compute_dtype=compute_dtype, out_dtype=xw_dtype,
                             vmem_limit_bytes=vmem_limit)
    xw = xw2d.reshape(T, b_pad, 4 * H)
    if t_pad != T:
        xw = jnp.pad(xw, ((0, t_pad - T), (0, 0), (0, 0)))

    out = _lstm_recurrence(xw, whh0, wih1, whh1, b1, wfc, bfc,
                           hidden_size=H, seq_len=T, t_chunk=t_chunk,
                           compute_dtype=compute_dtype,
                           vmem_limit_bytes=vmem_limit)
    return out[:B]


# ----------------------------------------------------------------------------
# Deterministic parameter init (mimics PyTorch uniform(-1/sqrt(H), 1/sqrt(H)))
# ----------------------------------------------------------------------------
def init_params(key, input_size, hidden_size):
    H = hidden_size
    k = 1.0 / np.sqrt(H)
    keys = jax.random.split(key, 10)

    def u(kk, shape):
        return jax.random.uniform(kk, shape, jnp.float32, -k, k)

    w_ih0 = u(keys[0], (4 * H, input_size))
    w_hh0 = u(keys[1], (4 * H, H))
    b_ih0 = u(keys[2], (4 * H,))
    b_hh0 = u(keys[3], (4 * H,))
    w_ih1 = u(keys[4], (4 * H, H))
    w_hh1 = u(keys[5], (4 * H, H))
    b_ih1 = u(keys[6], (4 * H,))
    b_hh1 = u(keys[7], (4 * H,))
    w_fc = u(keys[8], (1, H))
    b_fc = u(keys[9], (1,))

    return {
        "wih0_t": w_ih0.T,                                        # (D, 4H)
        "whh0_t": w_hh0.T,                                        # (H, 4H)
        "b0": (b_ih0 + b_hh0).reshape(1, 4 * H),                  # (1, 4H)
        "w1_stack": jnp.concatenate([w_ih1.T, w_hh1.T], axis=0),  # (2H, 4H)
        "b1": (b_ih1 + b_hh1).reshape(1, 4 * H),                  # (1, 4H)
        "wfc_row": w_fc,                                          # (1, H)
        "bfc": b_fc.reshape(1, 1),                                # (1, 1)
    }


# ----------------------------------------------------------------------------
# Pure-JAX reference (PyTorch LSTM semantics) for correctness check
# ----------------------------------------------------------------------------
def reference_forward(x, params, hidden_size):
    B, T, D = x.shape
    H = hidden_size
    wih1_t = params["w1_stack"][:H]
    whh1_t = params["w1_stack"][H:]

    def cell(xt, h, c, w_ih_t, w_hh_t, b):
        gates = xt @ w_ih_t + h @ w_hh_t + b
        i = jax.nn.sigmoid(gates[:, 0 * H:1 * H])
        f = jax.nn.sigmoid(gates[:, 1 * H:2 * H])
        g = jnp.tanh(gates[:, 2 * H:3 * H])
        o = jax.nn.sigmoid(gates[:, 3 * H:4 * H])
        c = f * c + i * g
        h = o * jnp.tanh(c)
        return h, c

    h0 = c0 = h1 = c1 = jnp.zeros((B, H), jnp.float32)
    for t in range(T):
        h0, c0 = cell(x[:, t, :], h0, c0,
                      params["wih0_t"], params["whh0_t"], params["b0"])
        h1, c1 = cell(h0, h1, c1, wih1_t, whh1_t, params["b1"])
    return jnp.sum(h1 * params["wfc_row"], axis=-1, keepdims=True) + params["bfc"]


if __name__ == "__main__":
    B, T, D, H = 2, 8, 4, 32   # batch, seq len, input_size, hidden_size

    key = jax.random.PRNGKey(0)
    k_x, k_p = jax.random.split(key)
    x = jax.random.normal(k_x, (B, T, D), jnp.float32)
    params = init_params(k_p, D, H)

    ref = reference_forward(x, params, H)

    # f32 matmul path: must match the PyTorch-semantics reference tightly
    # (sigmoid-via-tanh identity is exact up to rounding).
    out = jax.block_until_ready(lstm_model_forward(x, params, H))
    assert out.shape == (B, 1)
    np.testing.assert_allclose(np.asarray(out), np.asarray(ref),
                               rtol=2e-5, atol=2e-5)

    # bf16 matmul operands + bf16 xw storage (f32 state & accumulation).
    out_bf16 = jax.block_until_ready(
        lstm_model_forward(x, params, H, compute_dtype=jnp.bfloat16))
    np.testing.assert_allclose(np.asarray(out_bf16), np.asarray(ref),
                               rtol=5e-2, atol=5e-2)

    print("KERNEL_OK")
</pallas_src>

<mosaic_0001>
module attributes {stable_mosaic.version = 11 : i64} {
  func.func @_input_proj_kernel(%arg0: i32, %arg1: memref<64x4xf32, #tpu.memory_space<vmem>>, %arg2: memref<4x128xf32, #tpu.memory_space<vmem>>, %arg3: memref<1x128xf32, #tpu.memory_space<vmem>>, %arg4: memref<64x128xf32, #tpu.memory_space<vmem>>) attributes {dimension_semantics = [#tpu.dimension_semantics<parallel>], iteration_bounds = array<i64: 1>, scalar_prefetch = 0 : i64, scratch_operands = 0 : i64, tpu.core_type = #tpu.core_type<tc>, window_params = [{transform_indices = @transform_0, window_bounds = array<i64: 64, 4>}, {pipeline_mode = #tpu.pipeline_mode<synchronous>, transform_indices = @transform_1, window_bounds = array<i64: 4, 128>}, {pipeline_mode = #tpu.pipeline_mode<synchronous>, transform_indices = @transform_2, window_bounds = array<i64: 1, 128>}, {transform_indices = @transform_3, window_bounds = array<i64: 64, 128>}]} {
    %c0 = arith.constant 0 : index
    %c0_0 = arith.constant 0 : index
    %0 = vector.load %arg1[%c0, %c0_0] : memref<64x4xf32, #tpu.memory_space<vmem>>, vector<64x4xf32>
    %c0_1 = arith.constant 0 : index
    %c0_2 = arith.constant 0 : index
    %1 = vector.load %arg2[%c0_1, %c0_2] : memref<4x128xf32, #tpu.memory_space<vmem>>, vector<4x128xf32>
    %cst = arith.constant dense<0.000000e+00> : vector<64x128xf32>
    %2 = tpu.matmul %0, %1, %cst {dimension_numbers = #tpu.dot_dimension_numbers<[1], [0], [0], [1], [0, 0, 1, 1], [], []>} : vector<64x4xf32>, vector<4x128xf32>, vector<64x128xf32> -> vector<64x128xf32>
    %c0_3 = arith.constant 0 : index
    %c0_4 = arith.constant 0 : index
    %3 = vector.load %arg3[%c0_3, %c0_4] : memref<1x128xf32, #tpu.memory_space<vmem>>, vector<1x128xf32>
    %4 = vector.broadcast %3 : vector<1x128xf32> to vector<64x128xf32>
    %5 = arith.addf %2, %4 : vector<64x128xf32>
    %c0_5 = arith.constant 0 : index
    %c0_6 = arith.constant 0 : index
    %6 = vector.load %arg4[%c0_5, %c0_6] : memref<64x128xf32, #tpu.memory_space<vmem>>, vector<64x128xf32>
    tpu.vector_store %arg4[%c0_5, %c0_6], %5 {strides = array<i32>} : memref<64x128xf32, #tpu.memory_space<vmem>>, vector<64x128xf32>,
    return
  }
  func.func @transform_0(%arg0: i32) -> (i32, i32) {
    %c0_i32 = arith.constant 0 : i32
    %c0_i32_0 = arith.constant 0 : i32
    return %arg0, %c0_i32 : i32, i32
  }
  func.func @transform_1(%arg0: i32) -> (i32, i32) {
    %c0_i32 = arith.constant 0 : i32
    %c0_i32_0 = arith.constant 0 : i32
    %c0_i32_1 = arith.constant 0 : i32
    return %c0_i32, %c0_i32_0 : i32, i32
  }
  func.func @transform_2(%arg0: i32) -> (i32, i32) {
    %c0_i32 = arith.constant 0 : i32
    %c0_i32_0 = arith.constant 0 : i32
    %c0_i32_1 = arith.constant 0 : i32
    return %c0_i32, %c0_i32_0 : i32, i32
  }
  func.func @transform_3(%arg0: i32) -> (i32, i32) {
    %c0_i32 = arith.constant 0 : i32
    %c0_i32_0 = arith.constant 0 : i32
    return %arg0, %c0_i32 : i32, i32
  }
}

</mosaic_0001>

<bundles_post_ra>
// kernel: tpu_custom_call.1
= control target key start
LH: loop header
LB: loop body
LE: loop exit
PB: predicated region body
PF: predicated region fallthrough
CT: control target
= control target key end

     0   :  { %vm53_vm0 = vcmask 1043456   ;;  %vm28_vm1 = vcmask 31744   ;;  %s230_s0 = inlined_call_operand.vmem [shape: f32[64,4], index: 0, kind: input, shape index: {}]   ;;  %s231_s1 = inlined_call_operand.vmem [shape: f32[4,128], index: 1, kind: input, shape index: {}]   ;;  %s232_s2 = inlined_call_operand.vmem [shape: f32[1,128], index: 2, kind: input, shape index: {}]   ;;  %s233_s3 = inlined_call_operand.hbm [shape: f32[64,128], index: 3, kind: output, shape index: {}]  }
   0x1   :  { %v23_v0 = vld [vmem:[%s231_s1] sm:$0xf]  ;;  %v21_v2 = vld [vmem:[%s230_s0 + $0x30] sm:$0xff] }
   0x2   :  { %v19_v1 = vld [vmem:[%s230_s0 + $0x20] sm:$0xff]  ;;  %134 = vmatpush.msk.msra.mxu2 %vm53_vm0, %v23_v0  ;;  %135 = vmatpush.msk.msra.mxu3 %vm53_vm0, %v23_v0  ;;  %v17_v4 = vld [vmem:[%s230_s0 + $0x10] sm:$0xff] }
   0x3   :  { %v15_v3 = vld [vmem:[%s230_s0] sm:$0xff]  ;;  %129 = vmatmul.msk.f32.vlgmr.msra.gmra.mxu2 %vm28_vm1, %v19_v1  ;;  %131 = vmatmul.msk.f32.vlgmr.msra.gmra.mxu3 %vm28_vm1, %v21_v2 }
   0x4   :  { %124 = vmatpush.msk.msra.mxu0 %vm53_vm0, %v23_v0  ;;  %133 = vmatpush.msk.msra.mxu1 %vm53_vm0, %v23_v0 }
   0x5   :  { %8 = vsyncpa [#allocation3], 0  ;;  %125 = vmatmul.msk.f32.vlgmr.msra.gmra.mxu0 %vm28_vm1, %v15_v3  ;;  %127 = vmatmul.msk.f32.vlgmr.msra.gmra.mxu1 %vm28_vm1, %v17_v4  ;;  %v20_v5 = vld [vmem:[%s230_s0 + $0x28] sm:$0xff]  ;;  %v22_v6 = vld [vmem:[%s230_s0 + $0x38] sm:$0xff]  ;;  %s112_s6 = sshll.u32 %s233_s3, 4  ;;  %s167_s7 = smov 128   ;;  %s113_s6 = int_to_ptr.hbm [resolvable:$true] %s112_s6 }
   0x6   :  { %v16_v7 = vld [vmem:[%s230_s0 + $0x8] sm:$0xff]  ;;  %v18_v8 = vld [vmem:[%s230_s0 + $0x18] sm:$0xff]  ;;  %v139_v9 = vld [vmem:[%s232_s2] ss:$0 sm:$0xff]  ;;  %s166_s0 = smov [#allocation2]   ;;  %s168_s8 = smov 8  }
   0x7   :  { %s110_s4 = sshll.u32 %s166_s0, 4  ;;  %s111_s4 = int_to_ptr.vmem [resolvable:$true] %s110_s4 }
   0xb   :  { %130 = vmatmul.msk.f32.gmra.mxu2 %vm28_vm1, %v20_v5  ;;  %132 = vmatmul.msk.f32.gmra.mxu3 %vm28_vm1, %v22_v6 }
   0xd   :  { %126 = vmatmul.msk.f32.gmra.mxu0 %vm28_vm1, %v16_v7  ;;  %128 = vmatmul.msk.f32.gmra.mxu1 %vm28_vm1, %v18_v8 }
  0x82   :  { %v74_v10 = vpop.f32.mrf.mxu0  ;;  %v80_v11 = vpop.f32.mrf.mxu1 }
  0x83   :  { %v75_v12 = vadd.f32 %v139_v9, %v74_v10  ;;  %v81_v13 = vadd.f32 %v139_v9, %v80_v11 }
  0x85   :  { %98 = vst [vmem:[#allocation2] sm:$0xff] %v75_v12 }
  0x86   :  { %100 = vst [vmem:[#allocation2 + $0x10] sm:$0xff] %v81_v13  ;;  %v86_v14 = vpop.f32.mrf.mxu2  ;;  %v92_v15 = vpop.f32.mrf.mxu3 }
  0x87   :  { %v87_v16 = vadd.f32 %v139_v9, %v86_v14  ;;  %v93_v17 = vadd.f32 %v139_v9, %v92_v15 }
  0x89   :  { %102 = vst [vmem:[#allocation2 + $0x20] sm:$0xff] %v87_v16 }
  0x8a   :  { %104 = vst [vmem:[#allocation2 + $0x30] sm:$0xff] %v93_v17  ;;  %v77_v18 = vpop.f32.mrf.mxu0  ;;  %v83_v19 = vpop.f32.mrf.mxu1 }
  0x8b   :  { %v78_v20 = vadd.f32 %v139_v9, %v77_v18  ;;  %v84_v21 = vadd.f32 %v139_v9, %v83_v19 }
  0x8d   :  { %99 = vst [vmem:[#allocation2 + $0x8] sm:$0xff] %v78_v20 }
  0x8e   :  { %101 = vst [vmem:[#allocation2 + $0x18] sm:$0xff] %v84_v21  ;;  %v89_v22 = vpop.f32.mrf.mxu2  ;;  %v95_v23 = vpop.f32.mrf.mxu3 }
  0x8f   :  { %v90_v24 = vadd.f32 %v139_v9, %v89_v22  ;;  %v96_v25 = vadd.f32 %v139_v9, %v95_v23 }
  0x91   :  { %103 = vst [vmem:[#allocation2 + $0x28] sm:$0xff] %v90_v24 }
  0x92   :  { %105 = vst [vmem:[#allocation2 + $0x38] sm:$0xff] %v96_v25 }
  0x93   :  { %118 = dma.vmem_to_hbm [thread:$0]  %s111_s4, 1024, %s113_s6, [#allocation3], %s167_s7, %s167_s7, %s168_s8  }
  0x94   :  { %164 = dma.done.wait [#allocation3], 1024  }
  0x95   :  { %165 = vsyncadd [#allocation3], 4294966272 }
  0x96   :  { %123 = vsyncpa [#allocation3], 1 }

</bundles_post_ra>
